<compile_context>
chip_gen: v5e
topology: v5e:2x2
jax: 0.10.0
libtpu: 0.0.40
codegen_flags: <defaults>
</compile_context>

<pallas_src>
import functools

import jax
import jax.numpy as jnp
from jax.experimental import pallas as pl
from jax.experimental.pallas import tpu as pltpu


def _round_up(n, m):
    return ((n + m - 1) // m) * m


def _discriminator_kernel(x_ref, w1_ref, b1_ref, w2_ref, b2_ref, w3_ref, b3_ref, o_ref):
    """Whole MLP (2 MXU matmuls + VPU lane-reduce head) for one batch tile."""
    # Layer 1: bf16 x bf16 matmul on the MXU, f32 accumulate, f32 element-wise.
    h = jnp.dot(x_ref[...], w1_ref[...], preferred_element_type=jnp.float32)
    h = h + b1_ref[...]
    h = jnp.where(h > 0, h, 0.2 * h)  # LeakyReLU(0.2)

    # Layer 2: cast activations to bf16 only for the MXU; math stays f32.
    h = jnp.dot(h.astype(jnp.bfloat16), w2_ref[...], preferred_element_type=jnp.float32)
    h = h + b2_ref[...]
    h = jnp.where(h > 0, h, 0.2 * h)  # LeakyReLU(0.2)

    # Layer 3 (out_features == 1): VPU multiply + cross-lane sum instead of a
    # degenerate N=1 MXU matmul. b3 is a scalar pulled from SMEM.
    z = jnp.sum(h * w3_ref[...], axis=-1, keepdims=True) + b3_ref[0]

    # Sigmoid (exp goes to the EUP).
    o_ref[...] = jax.nn.sigmoid(z).astype(o_ref.dtype)


@functools.partial(jax.jit, static_argnames=("tile_b",))
def discriminator_forward(x, w1, b1, w2, b2, w3, b3, *, tile_b=None):
    """x: [B, D_in] f32; w_i: [in, out]; b_i: [1, out] (matches PyTorch x @ W.T + b)."""
    B, D_in = x.shape
    H = w1.shape[1]
    H2 = w2.shape[1]

    if tile_b is None:
        # Large tile to amortize per-step overhead (mem-bound kernel), but keep
        # >= 2 grid steps when possible so v7x's two TensorCores both get work.
        tile_b = max(16, min(1024, _round_up(B, 32) // 2))
    tile_b = _round_up(max(int(tile_b), 16), 16)  # bf16 sublane-pack friendly

    B_pad = _round_up(B, tile_b)
    if B_pad != B:
        x = jnp.pad(x, ((0, B_pad - B), (0, 0)))

    # bf16 inputs/weights halve HBM traffic; MXU accumulates in f32.
    x_bf = x.astype(jnp.bfloat16)
    w1_bf = w1.astype(jnp.bfloat16)
    w2_bf = w2.astype(jnp.bfloat16)
    b1_f = b1.reshape(1, H).astype(jnp.float32)
    b2_f = b2.reshape(1, H2).astype(jnp.float32)
    w3_row = w3.reshape(1, H2).astype(jnp.float32)  # used on the VPU, keep f32
    b3_s = b3.reshape(1).astype(jnp.float32)        # scalar, lives in SMEM

    grid = (B_pad // tile_b,)

    # Advisory cost estimate so XLA can overlap this call with surrounding ops.
    flops = 2 * B_pad * (D_in * H + H * H2 + H2)
    bytes_accessed = (
        B_pad * D_in * 2                      # x (bf16)
        + (D_in * H + H * H2) * 2             # w1, w2 (bf16)
        + (H + H2 + H2 + 1) * 4               # biases + w3 row (f32)
        + B_pad * 4                           # output (f32)
    )
    cost = pl.CostEstimate(flops=flops, transcendentals=B_pad,
                           bytes_accessed=bytes_accessed)

    out = pl.pallas_call(
        _discriminator_kernel,
        out_shape=jax.ShapeDtypeStruct((B_pad, 1), jnp.float32),
        grid_spec=pltpu.PrefetchScalarGridSpec(
            num_scalar_prefetch=0,
            grid=grid,
            in_specs=[
                pl.BlockSpec((tile_b, D_in), lambda i: (i, 0)),        # x tile (bf16)
                pl.BlockSpec((D_in, H), lambda i: (0, 0)),             # w1 (bf16, full)
                pl.BlockSpec((1, H), lambda i: (0, 0)),                # b1 (f32)
                pl.BlockSpec((H, H2), lambda i: (0, 0)),               # w2 (bf16, full)
                pl.BlockSpec((1, H2), lambda i: (0, 0)),               # b2 (f32)
                pl.BlockSpec((1, H2), lambda i: (0, 0)),               # w3 as a row (f32)
                pl.BlockSpec(memory_space=pltpu.MemorySpace.SMEM),     # b3 scalar
            ],
            out_specs=pl.BlockSpec((tile_b, 1), lambda i: (i, 0)),
        ),
        compiler_params=pltpu.CompilerParams(
            dimension_semantics=("parallel",),
        ),
        cost_estimate=cost,
    )(x_bf, w1_bf, b1_f, w2_bf, b2_f, w3_row, b3_s)

    return out[:B]


def _init_linear(key, fan_in, fan_out):
    """Deterministic init mimicking PyTorch nn.Linear (uniform +/- 1/sqrt(fan_in))."""
    kw, kb = jax.random.split(key)
    bound = 1.0 / jnp.sqrt(float(fan_in))
    w = jax.random.uniform(kw, (fan_in, fan_out), jnp.float32, -bound, bound)
    b = jax.random.uniform(kb, (1, fan_out), jnp.float32, -bound, bound)
    return w, b


def _reference_forward_f32(x, w1, b1, w2, b2, w3, b3):
    """Pure-f32 reference matching the PyTorch module."""
    h = x @ w1 + b1.reshape(1, -1)
    h = jnp.where(h > 0, h, 0.2 * h)
    h = h @ w2 + b2.reshape(1, -1)
    h = jnp.where(h > 0, h, 0.2 * h)
    z = h @ w3 + b3.reshape(1, -1)
    return jax.nn.sigmoid(z)


def _reference_forward_bf16(x, w1, b1, w2, b2, w3, b3):
    """Reference that mimics the kernel's bf16-input / f32-accumulate handling."""
    h = jnp.dot(x.astype(jnp.bfloat16), w1.astype(jnp.bfloat16),
                preferred_element_type=jnp.float32) + b1.reshape(1, -1)
    h = jnp.where(h > 0, h, 0.2 * h)
    h = jnp.dot(h.astype(jnp.bfloat16), w2.astype(jnp.bfloat16),
                preferred_element_type=jnp.float32) + b2.reshape(1, -1)
    h = jnp.where(h > 0, h, 0.2 * h)
    z = jnp.sum(h * w3.reshape(1, -1), axis=-1, keepdims=True) + b3.reshape(1, 1)
    return jax.nn.sigmoid(z)


if __name__ == "__main__":
    # Small config consistent with the module: input_size=32, hidden_size=32.
    # batch=256 keeps the test tiny but still exercises a 2-step parallel grid.
    batch = 256
    input_size = 32
    hidden_size = 32
    hidden_half = hidden_size // 2

    key = jax.random.PRNGKey(0)
    kx, k1, k2, k3 = jax.random.split(key, 4)

    x = jax.random.normal(kx, (batch, input_size), jnp.float32)
    w1, b1 = _init_linear(k1, input_size, hidden_size)
    w2, b2 = _init_linear(k2, hidden_size, hidden_half)
    w3, b3 = _init_linear(k3, hidden_half, 1)

    out = discriminator_forward(x, w1, b1, w2, b2, w3, b3)
    out = jax.block_until_ready(out)
    assert out.shape == (batch, 1)

    ref_bf16 = _reference_forward_bf16(x, w1, b1, w2, b2, w3, b3)
    assert jnp.allclose(out, ref_bf16, atol=1e-4, rtol=1e-4), \
        "mismatch vs bf16-matched reference"

    ref_f32 = _reference_forward_f32(x, w1, b1, w2, b2, w3, b3)
    assert jnp.allclose(out, ref_f32, atol=3e-2, rtol=0.0), \
        "mismatch vs pure-f32 reference (semantics)"

    # Ragged batch exercises the padding path (no B % tile_b restriction anymore).
    out_r = jax.block_until_ready(
        discriminator_forward(x[:50], w1, b1, w2, b2, w3, b3))
    assert out_r.shape == (50, 1)
    assert jnp.allclose(out_r, ref_bf16[:50], atol=1e-4, rtol=1e-4), \
        "mismatch on ragged batch"

    print("KERNEL_OK")
</pallas_src>

<mosaic_0001>
module attributes {stable_mosaic.version = 11 : i64} {
  func.func @_discriminator_kernel(%arg0: i32, %arg1: memref<128x32xbf16, #tpu.memory_space<vmem>>, %arg2: memref<32x32xbf16, #tpu.memory_space<vmem>>, %arg3: memref<1x32xf32, #tpu.memory_space<vmem>>, %arg4: memref<32x16xbf16, #tpu.memory_space<vmem>>, %arg5: memref<1x16xf32, #tpu.memory_space<vmem>>, %arg6: memref<1x16xf32, #tpu.memory_space<vmem>>, %arg7: memref<1xf32, #tpu.memory_space<smem>>, %arg8: memref<128x1xf32, #tpu.memory_space<vmem>>) attributes {dimension_semantics = [#tpu.dimension_semantics<parallel>], iteration_bounds = array<i64: 2>, scalar_prefetch = 0 : i64, scratch_operands = 0 : i64, tpu.core_type = #tpu.core_type<tc>, window_params = [{transform_indices = @transform_0, window_bounds = array<i64: 128, 32>}, {pipeline_mode = #tpu.pipeline_mode<synchronous>, transform_indices = @transform_1, window_bounds = array<i64: 32, 32>}, {pipeline_mode = #tpu.pipeline_mode<synchronous>, transform_indices = @transform_2, window_bounds = array<i64: 1, 32>}, {pipeline_mode = #tpu.pipeline_mode<synchronous>, transform_indices = @transform_3, window_bounds = array<i64: 32, 16>}, {pipeline_mode = #tpu.pipeline_mode<synchronous>, transform_indices = @transform_4, window_bounds = array<i64: 1, 16>}, {pipeline_mode = #tpu.pipeline_mode<synchronous>, transform_indices = @transform_5, window_bounds = array<i64: 1, 16>}, {transform_indices = @transform_6, window_bounds = array<i64: 1>}, {transform_indices = @transform_7, window_bounds = array<i64: 128, 1>}]} {
    %c0 = arith.constant 0 : index
    %c0_0 = arith.constant 0 : index
    %0 = vector.load %arg1[%c0, %c0_0] : memref<128x32xbf16, #tpu.memory_space<vmem>>, vector<128x32xbf16>
    %c0_1 = arith.constant 0 : index
    %c0_2 = arith.constant 0 : index
    %1 = vector.load %arg2[%c0_1, %c0_2] : memref<32x32xbf16, #tpu.memory_space<vmem>>, vector<32x32xbf16>
    %cst = arith.constant dense<0.000000e+00> : vector<128x32xf32>
    %2 = tpu.matmul %0, %1, %cst {dimension_numbers = #tpu.dot_dimension_numbers<[1], [0], [0], [1], [0, 0, 1, 1], [], []>} : vector<128x32xbf16>, vector<32x32xbf16>, vector<128x32xf32> -> vector<128x32xf32>
    %c0_3 = arith.constant 0 : index
    %c0_4 = arith.constant 0 : index
    %3 = vector.load %arg3[%c0_3, %c0_4] : memref<1x32xf32, #tpu.memory_space<vmem>>, vector<1x32xf32>
    %4 = vector.broadcast %3 : vector<1x32xf32> to vector<128x32xf32>
    %5 = arith.addf %2, %4 : vector<128x32xf32>
    %cst_5 = arith.constant 0.000000e+00 : f32
    %6 = vector.broadcast %cst_5 : f32 to vector<128x32xf32>
    %7 = arith.cmpf ogt, %5, %6 : vector<128x32xf32>
    %cst_6 = arith.constant 2.000000e-01 : f32
    %8 = vector.broadcast %cst_6 : f32 to vector<128x32xf32>
    %9 = arith.mulf %8, %5 : vector<128x32xf32>
    %10 = arith.select %7, %5, %9 : vector<128x32xi1>, vector<128x32xf32>
    %11 = arith.truncf %10 : vector<128x32xf32> to vector<128x32xbf16>
    %c0_7 = arith.constant 0 : index
    %c0_8 = arith.constant 0 : index
    %12 = vector.load %arg4[%c0_7, %c0_8] : memref<32x16xbf16, #tpu.memory_space<vmem>>, vector<32x16xbf16>
    %cst_9 = arith.constant dense<0.000000e+00> : vector<128x16xf32>
    %13 = tpu.matmul %11, %12, %cst_9 {dimension_numbers = #tpu.dot_dimension_numbers<[1], [0], [0], [1], [0, 0, 1, 1], [], []>} : vector<128x32xbf16>, vector<32x16xbf16>, vector<128x16xf32> -> vector<128x16xf32>
    %c0_10 = arith.constant 0 : index
    %c0_11 = arith.constant 0 : index
    %14 = vector.load %arg5[%c0_10, %c0_11] : memref<1x16xf32, #tpu.memory_space<vmem>>, vector<1x16xf32>
    %15 = vector.broadcast %14 : vector<1x16xf32> to vector<128x16xf32>
    %16 = arith.addf %13, %15 : vector<128x16xf32>
    %cst_12 = arith.constant 0.000000e+00 : f32
    %17 = vector.broadcast %cst_12 : f32 to vector<128x16xf32>
    %18 = arith.cmpf ogt, %16, %17 : vector<128x16xf32>
    %cst_13 = arith.constant 2.000000e-01 : f32
    %19 = vector.broadcast %cst_13 : f32 to vector<128x16xf32>
    %20 = arith.mulf %19, %16 : vector<128x16xf32>
    %21 = arith.select %18, %16, %20 : vector<128x16xi1>, vector<128x16xf32>
    %c0_14 = arith.constant 0 : index
    %c0_15 = arith.constant 0 : index
    %22 = vector.load %arg6[%c0_14, %c0_15] : memref<1x16xf32, #tpu.memory_space<vmem>>, vector<1x16xf32>
    %23 = vector.broadcast %22 : vector<1x16xf32> to vector<128x16xf32>
    %24 = arith.mulf %21, %23 : vector<128x16xf32>
    %cst_16 = arith.constant dense<0.000000e+00> : vector<128xf32>
    %25 = vector.multi_reduction <add>, %24, %cst_16 [1] : vector<128x16xf32> to vector<128xf32>
    %26 = vector.shape_cast %25 : vector<128xf32> to vector<128x1xf32>
    %c0_17 = arith.constant 0 : index
    %27 = memref.load %arg7[%c0_17] : memref<1xf32, #tpu.memory_space<smem>>
    %28 = vector.broadcast %27 : f32 to vector<128x1xf32>
    %29 = arith.addf %26, %28 : vector<128x1xf32>
    %30 = arith.negf %29 : vector<128x1xf32>
    %31 = math.exp %30 : vector<128x1xf32>
    %cst_18 = arith.constant 1.000000e+00 : f32
    %32 = vector.broadcast %cst_18 : f32 to vector<128x1xf32>
    %33 = arith.addf %32, %31 : vector<128x1xf32>
    %34 = arith.divf %32, %33 : vector<128x1xf32>
    %c0_19 = arith.constant 0 : index
    %c0_20 = arith.constant 0 : index
    %35 = vector.load %arg8[%c0_19, %c0_20] : memref<128x1xf32, #tpu.memory_space<vmem>>, vector<128x1xf32>
    tpu.vector_store %arg8[%c0_19, %c0_20], %34 {strides = array<i32>} : memref<128x1xf32, #tpu.memory_space<vmem>>, vector<128x1xf32>,
    return
  }
  func.func @transform_0(%arg0: i32) -> (i32, i32) {
    %c0_i32 = arith.constant 0 : i32
    %c0_i32_0 = arith.constant 0 : i32
    return %arg0, %c0_i32 : i32, i32
  }
  func.func @transform_1(%arg0: i32) -> (i32, i32) {
    %c0_i32 = arith.constant 0 : i32
    %c0_i32_0 = arith.constant 0 : i32
    %c0_i32_1 = arith.constant 0 : i32
    return %c0_i32, %c0_i32_0 : i32, i32
  }
  func.func @transform_2(%arg0: i32) -> (i32, i32) {
    %c0_i32 = arith.constant 0 : i32
    %c0_i32_0 = arith.constant 0 : i32
    %c0_i32_1 = arith.constant 0 : i32
    return %c0_i32, %c0_i32_0 : i32, i32
  }
  func.func @transform_3(%arg0: i32) -> (i32, i32) {
    %c0_i32 = arith.constant 0 : i32
    %c0_i32_0 = arith.constant 0 : i32
    %c0_i32_1 = arith.constant 0 : i32
    return %c0_i32, %c0_i32_0 : i32, i32
  }
  func.func @transform_4(%arg0: i32) -> (i32, i32) {
    %c0_i32 = arith.constant 0 : i32
    %c0_i32_0 = arith.constant 0 : i32
    %c0_i32_1 = arith.constant 0 : i32
    return %c0_i32, %c0_i32_0 : i32, i32
  }
  func.func @transform_5(%arg0: i32) -> (i32, i32) {
    %c0_i32 = arith.constant 0 : i32
    %c0_i32_0 = arith.constant 0 : i32
    %c0_i32_1 = arith.constant 0 : i32
    return %c0_i32, %c0_i32_0 : i32, i32
  }
  func.func @transform_6(%arg0: i32) -> i32 {
    %c0_i32 = arith.constant 0 : i32
    %c0_i32_0 = arith.constant 0 : i32
    return %c0_i32 : i32
  }
  func.func @transform_7(%arg0: i32) -> (i32, i32) {
    %c0_i32 = arith.constant 0 : i32
    %c0_i32_0 = arith.constant 0 : i32
    return %arg0, %c0_i32 : i32, i32
  }
}

</mosaic_0001>

<bundles_post_ra>
// kernel: discriminator_forward.1
= control target key start
LH: loop header
LB: loop body
LE: loop exit
PB: predicated region body
PF: predicated region fallthrough
CT: control target
= control target key end

     0   :  { %s1328_s26 = smov 0   ;;  %s1617_s0 = inlined_call_operand.vmem [shape: bf16[256,32], index: 0, kind: input, shape index: {}]   ;;  %s1618_s1 = inlined_call_operand.vmem [shape: bf16[32,32], index: 1, kind: input, shape index: {}]   ;;  %s1619_s2 = inlined_call_operand.vmem [shape: f32[1,32], index: 2, kind: input, shape index: {}]   ;;  %s1620_s3 = inlined_call_operand.vmem [shape: bf16[32,16], index: 3, kind: input, shape index: {}]   ;;  %s1621_s4 = inlined_call_operand.vmem [shape: f32[1,16], index: 4, kind: input, shape index: {}]   ;;  %s1622_s5 = inlined_call_operand.vmem [shape: f32[1,16], index: 5, kind: input, shape index: {}]   ;;  %s1623_s6 = inlined_call_operand.<no memory space> [shape: f32[1], index: 6, kind: input, shape index: {}]   ;;  %s1624_s7 = inlined_call_operand.vmem [shape: f32[256,1], index: 7, kind: output, shape index: {}]  }
   0x1   :  { %12 = sst [smem:[#allocation2]] %s1623_s6 }
   0x2 LB: > { %s1095_s27 = sadd.s32 4294967295, %s1283_s26   ;;  %p1099_p0 = scmp.ge.s32.totalorder %s1283_s26, 1  ;;  %s1283_s26 = sphi %s1328_s26, %s18_s26  }
   0x3   : > { %p239_p1 = scmp.lt.s32.totalorder %s1283_s26, 3 }
   0x5   : > { %p240_p2 = pnand %p1099_p0, %p239_p1 }
   0x6   : > { %s1100_s6 = sshll.u32 (!%p240_p2), %s1095_s27, 4  ;;  %s700_s23 = sld [smem:[#allocation2]] (!%p240_p2) }
   0x7   : > { %243 = sbr.rel (%p240_p2) target bundleno = 510 (0x1fe), region = 48  ;;  %p272_p3 = scmp.lt.s32.totalorder (!%p240_p2), %s1100_s6, 31 }
   0xc   : > { %v1195_v0 = vld [vmem:[%s1618_s1 + $0x8] sm:$0xff]  ;;  %v1194_v1 = vld [vmem:[%s1618_s1] sm:$0xff]  ;;  %s1634_s6 = smov (!%p272_p3, %s1100_s6), 31  ;;  %vm360_vm0 = vcmask 261120  }
   0xd   : > { %391 = vmatpush.bf16.msra.mxu0 %v1195_v0  ;;  %1198 = vmatpush.bf16.msra.mxu2 %v1195_v0  ;;  %s1101_s9 = sshll.u32 %s1634_s6, 2  ;;  %v1197_v10 = vld [vmem:[%s1620_s3 + $0x8] sm:$0xff]  ;;  %v1196_v11 = vld [vmem:[%s1620_s3] sm:$0xff]  ;;  %s1103_s24 = sshll.u32 %s1634_s6, 3 }
   0xe   : > { %s275_s12 = scalar_lea.vmem %s1617_s0, %s1101_s9  ;;  %540 = vmatpush.bf16.msra.mxu1 %v1197_v10  ;;  %1200 = vmatpush.bf16.msra.mxu3 %v1197_v10  ;;  %v1365_v13 = vld [vmem:[%s1619_s2] ss:$0 sm:$0xff]  ;;  %s1464_s28 = scalar_lea.vmem %s1624_s7, %s1103_s24 }
   0xf   : > { %v1186_v2 = vld [vmem:[%s275_s12] sm:$0xff]  ;;  %v1187_v4 = vld [vmem:[%s275_s12 + $0x8] sm:$0xff]  ;;  %v1188_v6 = vld [vmem:[%s275_s12 + $0x10] sm:$0xff] }
  0x10   : > { %v1190_v3 = vld [vmem:[%s275_s12 + $0x20] sm:$0xff]  ;;  %v1191_v5 = vld [vmem:[%s275_s12 + $0x28] sm:$0xff]  ;;  %v1192_v7 = vld [vmem:[%s275_s12 + $0x30] sm:$0xff] }
  0x11   : > { %392 = vmatpush.bf16.msra.mxu0 %v1194_v1  ;;  %1199 = vmatpush.bf16.msra.mxu2 %v1194_v1  ;;  %v1189_v8 = vld [vmem:[%s275_s12 + $0x18] sm:$0xff] }
  0x12   : > { %v1193_v9 = vld [vmem:[%s275_s12 + $0x38] sm:$0xff]  ;;  %541 = vmatpush.bf16.msra.mxu1 %v1196_v11  ;;  %1201 = vmatpush.bf16.msra.mxu3 %v1196_v11 }
  0x14   : > { %1144 = vmatmul.msk.bf16.vlgmr.msra.gmra.mxu0 %vm360_vm0, %v1186_v2  ;;  %1148 = vmatmul.msk.bf16.vlgmr.msra.gmra.mxu2 %vm360_vm0, %v1190_v3 }
  0x24   : > { %1145 = vmatmul.msk.bf16.gmra.mxu0 %vm360_vm0, %v1187_v4  ;;  %1149 = vmatmul.msk.bf16.gmra.mxu2 %vm360_vm0, %v1191_v5 }
  0x34   : > { %1146 = vmatmul.msk.bf16.gmra.mxu0 %vm360_vm0, %v1188_v6  ;;  %1150 = vmatmul.msk.bf16.gmra.mxu2 %vm360_vm0, %v1192_v7 }
  0x44   : > { %1147 = vmatmul.msk.bf16.gmra.mxu0 %vm360_vm0, %v1189_v8  ;;  %1151 = vmatmul.msk.bf16.gmra.mxu2 %vm360_vm0, %v1193_v9 }
  0x91   : > { %v394_v12 = vpop.f32.mrf.mxu0 }
  0x92   : > { %v395_v14 = vadd.f32 %v1365_v13, %v394_v12 }
  0x94   : > { %v450_v17 = vmul.f32 0.2, %v395_v14  ;;  %vm434_vm1 = vcmp.gt.f32.partialorder %v395_v14, 0.0 }
  0x96   : > { %v466_v21 = vsel %vm434_vm1, %v395_v14, %v450_v17 }
  0x97   : > { %v414_v15 = vpop.f32.mrf.mxu2 }
  0x98   : > { %v415_v19 = vadd.f32 %v1365_v13, %v414_v15 }
  0x99   : > { %v396_v16 = vpop.f32.mrf.mxu0 }
  0x9a   : > { %v397_v18 = vadd.f32 %v1365_v13, %v396_v16  ;;  %v458_v25 = vmul.f32 0.2, %v415_v19  ;;  %vm442_vm3 = vcmp.gt.f32.partialorder %v415_v19, 0.0 }
  0x9c   : > { %vm435_vm2 = vcmp.gt.f32.partialorder %v397_v18, 0.0  ;;  %v451_v20 = vmul.f32 0.2, %v397_v18  ;;  %v474_v29 = vsel %vm442_vm3, %v415_v19, %v458_v25  ;;  %vm651_vm3 = vcmask 130048  }
  0x9e   : > { %v467_v22 = vsel %vm435_vm2, %v397_v18, %v451_v20 }
  0x9f   : > { %v416_v23 = vpop.f32.mrf.mxu2  ;;  %v482_v24 = vpack.c.bf16 %v467_v22, %v466_v21  ;;  %v1394_v22 = vld [vmem:[%s1621_s4] ss:$0 sm:$0xff] }
  0xa0   : > { %v417_v26 = vadd.f32 %v1365_v13, %v416_v23 }
  0xa1   : > { %v399_v27 = vpop.f32.mrf.mxu0  ;;  %1160 = vmatmul.msk.bf16.vlgmr.msra.gmra.mxu1 %vm360_vm0, %v482_v24 }
  0xa2   : > { %vm443_vm4 = vcmp.gt.f32.partialorder %v417_v26, 0.0  ;;  %v459_v28 = vmul.f32 0.2, %v417_v26  ;;  %v400_v32 = vadd.f32 %v1365_v13, %v399_v27 }
  0xa4   : > { %v475_v30 = vsel %vm443_vm4, %v417_v26, %v459_v28  ;;  %v452_v35 = vmul.f32 0.2, %v400_v32  ;;  %vm436_vm5 = vcmp.gt.f32.partialorder %v400_v32, 0.0 }
  0xa5   : > { %v486_v31 = vpack.c.bf16 %v475_v30, %v474_v29 }
  0xa6   : > { %v468_v39 = vsel %vm436_vm5, %v400_v32, %v452_v35 }
  0xa7   : > { %v419_v33 = vpop.f32.mrf.mxu2  ;;  %1164 = vmatmul.msk.bf16.vlgmr.msra.gmra.mxu3 %vm360_vm0, %v486_v31 }
  0xa8   : > { %v420_v37 = vadd.f32 %v1365_v13, %v419_v33 }
  0xa9   : > { %v401_v34 = vpop.f32.mrf.mxu0 }
  0xaa   : > { %v402_v36 = vadd.f32 %v1365_v13, %v401_v34  ;;  %v460_v43 = vmul.f32 0.2, %v420_v37  ;;  %vm444_vm7 = vcmp.gt.f32.partialorder %v420_v37, 0.0 }
  0xac   : > { %vm437_vm6 = vcmp.gt.f32.partialorder %v402_v36, 0.0  ;;  %v453_v38 = vmul.f32 0.2, %v402_v36  ;;  %v476_v47 = vsel %vm444_vm7, %v420_v37, %v460_v43 }
  0xae   : > { %v469_v40 = vsel %vm437_vm6, %v402_v36, %v453_v38 }
  0xaf   : > { %v421_v41 = vpop.f32.mrf.mxu2  ;;  %v483_v42 = vpack.c.bf16 %v469_v40, %v468_v39 }
  0xb0   : > { %v422_v44 = vadd.f32 %v1365_v13, %v421_v41 }
  0xb1   : > { %v404_v45 = vpop.f32.mrf.mxu0  ;;  %1161 = vmatmul.msk.bf16.gmra.mxu1 %vm360_vm0, %v483_v42 }
  0xb2   : > { %vm445_vm8 = vcmp.gt.f32.partialorder %v422_v44, 0.0  ;;  %v461_v46 = vmul.f32 0.2, %v422_v44  ;;  %v405_v50 = vadd.f32 %v1365_v13, %v404_v45 }
  0xb4   : > { %v477_v48 = vsel %vm445_vm8, %v422_v44, %v461_v46  ;;  %v454_v53 = vmul.f32 0.2, %v405_v50  ;;  %vm438_vm9 = vcmp.gt.f32.partialorder %v405_v50, 0.0 }
  0xb5   : > { %v487_v49 = vpack.c.bf16 %v477_v48, %v476_v47 }
  0xb6   : > { %v470_v57 = vsel %vm438_vm9, %v405_v50, %v454_v53 }
  0xb7   : > { %v424_v51 = vpop.f32.mrf.mxu2  ;;  %1165 = vmatmul.msk.bf16.gmra.mxu3 %vm360_vm0, %v487_v49 }
  0xb8   : > { %v425_v55 = vadd.f32 %v1365_v13, %v424_v51 }
  0xb9   : > { %v406_v52 = vpop.f32.mrf.mxu0 }
  0xba   : > { %v407_v54 = vadd.f32 %v1365_v13, %v406_v52  ;;  %v462_v61 = vmul.f32 0.2, %v425_v55  ;;  %vm446_vm11 = vcmp.gt.f32.partialorder %v425_v55, 0.0 }
  0xbc   : > { %vm439_vm10 = vcmp.gt.f32.partialorder %v407_v54, 0.0  ;;  %v455_v56 = vmul.f32 0.2, %v407_v54  ;;  %v478_v1 = vsel %vm446_vm11, %v425_v55, %v462_v61 }
  0xbe   : > { %v471_v58 = vsel %vm439_vm10, %v407_v54, %v455_v56 }
  0xbf   : > { %v426_v59 = vpop.f32.mrf.mxu2  ;;  %v484_v60 = vpack.c.bf16 %v471_v58, %v470_v57 }
  0xc0   : > { %v427_v62 = vadd.f32 %v1365_v13, %v426_v59 }
  0xc1   : > { %v409_v63 = vpop.f32.mrf.mxu0  ;;  %1162 = vmatmul.msk.bf16.gmra.mxu1 %vm360_vm0, %v484_v60 }
  0xc2   : > { %vm447_vm12 = vcmp.gt.f32.partialorder %v427_v62, 0.0  ;;  %v463_v0 = vmul.f32 0.2, %v427_v62  ;;  %v410_v4 = vadd.f32 %v1365_v13, %v409_v63 }
  0xc4   : > { %v479_v2 = vsel %vm447_vm12, %v427_v62, %v463_v0  ;;  %v456_v7 = vmul.f32 0.2, %v410_v4  ;;  %vm440_vm13 = vcmp.gt.f32.partialorder %v410_v4, 0.0 }
  0xc5   : > { %v488_v3 = vpack.c.bf16 %v479_v2, %v478_v1 }
  0xc6   : > { %v472_v11 = vsel %vm440_vm13, %v410_v4, %v456_v7 }
  0xc7   : > { %v429_v5 = vpop.f32.mrf.mxu2  ;;  %1166 = vmatmul.msk.bf16.gmra.mxu3 %vm360_vm0, %v488_v3 }
  0xc8   : > { %v430_v9 = vadd.f32 %v1365_v13, %v429_v5 }
  0xc9   : > { %v411_v6 = vpop.f32.mrf.mxu0 }
  0xca   : > { %v412_v8 = vadd.f32 %v1365_v13, %v411_v6  ;;  %v464_v16 = vmul.f32 0.2, %v430_v9  ;;  %vm448_vm15 = vcmp.gt.f32.partialorder %v430_v9, 0.0 }
  0xcc   : > { %vm441_vm14 = vcmp.gt.f32.partialorder %v412_v8, 0.0  ;;  %v457_v10 = vmul.f32 0.2, %v412_v8  ;;  %v480_v19 = vsel %vm448_vm15, %v430_v9, %v464_v16 }
  0xce   : > { %v473_v12 = vsel %vm441_vm14, %v412_v8, %v457_v10 }
  0xcf   : > { %v431_v14 = vpop.f32.mrf.mxu2  ;;  %v485_v15 = vpack.c.bf16 %v473_v12, %v472_v11 }
  0xd0   : > { %v432_v17 = vadd.f32 %v1365_v13, %v431_v14  ;;  %v1400_v13 = vld [vmem:[%s1622_s5] ss:$0 sm:$0xff] }
  0xd1   : > { %1163 = vmatmul.msk.bf16.gmra.mxu1 %vm360_vm0, %v485_v15 }
  0xd2   : > { %vm449_vm1 = vcmp.gt.f32.partialorder %v432_v17, 0.0  ;;  %v465_v18 = vmul.f32 0.2, %v432_v17 }
  0xd4   : > { %v481_v20 = vsel %vm449_vm1, %v432_v17, %v465_v18 }
  0xd5   : > { %v489_v21 = vpack.c.bf16 %v481_v20, %v480_v19 }
  0xd7   : > { %1167 = vmatmul.msk.bf16.gmra.mxu3 %vm360_vm0, %v489_v21 }
 0x11e   : > { %v543_v23 = vpop.f32.mrf.mxu1 }
 0x11f   : > { %v544_v24 = vadd.f32 %v1394_v22, %v543_v23 }
 0x121   : > { %v599_v25 = vmul.f32 0.2, %v544_v24  ;;  %vm583_vm2 = vcmp.gt.f32.partialorder %v544_v24, 0.0 }
 0x123   : > { %v615_v26 = vsel %vm583_vm2, %v544_v24, %v599_v25 }
 0x124   : > { %v635_v27 = vmul.f32 %v1400_v13, %v615_v26 }
 0x126   : > { %v545_v28 = vpop.f32.mrf.mxu1  ;;  %v652_v29 = vsel %vm651_vm3, %v635_v27, 0.0 }
 0x127   : > { %v546_v30 = vadd.f32 %v1394_v22, %v545_v28  ;;  %653 = vadd.xlane.f32.xlu0 %v652_v29 }
 0x129   : > { %vm584_vm0 = vcmp.gt.f32.partialorder %v546_v30, 0.0  ;;  %v600_v31 = vmul.f32 0.2, %v546_v30 }
 0x12a   : > { %v563_v32 = vpop.f32.mrf.mxu3 }
 0x12b   : > { %v564_v33 = vadd.f32 %v1394_v22, %v563_v32  ;;  %v616_v34 = vsel %vm584_vm0, %v546_v30, %v600_v31 }
 0x12c   : > { %v636_v35 = vmul.f32 %v1400_v13, %v616_v34 }
 0x12d   : > { %v607_v36 = vmul.f32 0.2, %v564_v33  ;;  %vm591_vm4 = vcmp.gt.f32.partialorder %v564_v33, 0.0 }
 0x12e   : > { %v548_v37 = vpop.f32.mrf.mxu1  ;;  %v655_v38 = vsel %vm651_vm3, %v636_v35, 0.0 }
 0x12f   : > { %v549_v39 = vadd.f32 %v1394_v22, %v548_v37  ;;  %656 = vadd.xlane.f32.xlu0 %v655_v38  ;;  %v623_v40 = vsel %vm591_vm4, %v564_v33, %v607_v36  ;;  %vm1022_vm4 = vcmask 7168  }
 0x130   : > { %v643_v41 = vmul.f32 %v1400_v13, %v623_v40 }
 0x131   : > { %v601_v42 = vmul.f32 0.2, %v549_v39  ;;  %vm585_vm5 = vcmp.gt.f32.partialorder %v549_v39, 0.0 }
 0x132   : > { %v565_v43 = vpop.f32.mrf.mxu3  ;;  %v676_v44 = vsel %vm651_vm3, %v643_v41, 0.0 }
 0x133   : > { %v566_v45 = vadd.f32 %v1394_v22, %v565_v43  ;;  %677 = vadd.xlane.f32.xlu2 %v676_v44  ;;  %v617_v46 = vsel %vm585_vm5, %v549_v39, %v601_v42 }
 0x134   : > { %v637_v47 = vmul.f32 %v1400_v13, %v617_v46 }
 0x135   : > { %vm592_vm6 = vcmp.gt.f32.partialorder %v566_v45, 0.0  ;;  %v608_v48 = vmul.f32 0.2, %v566_v45 }
 0x136   : > { %v550_v49 = vpop.f32.mrf.mxu1  ;;  %v658_v50 = vsel %vm651_vm3, %v637_v47, 0.0 }
 0x137   : > { %v551_v51 = vadd.f32 %v1394_v22, %v550_v49  ;;  %659 = vadd.xlane.f32.xlu1 %v658_v50  ;;  %v624_v52 = vsel %vm592_vm6, %v566_v45, %v608_v48 }
 0x138   : > { %v644_v53 = vmul.f32 %v1400_v13, %v624_v52 }
 0x139   : > { %vm586_vm7 = vcmp.gt.f32.partialorder %v551_v51, 0.0  ;;  %v602_v54 = vmul.f32 0.2, %v551_v51 }
 0x13a   : > { %v568_v55 = vpop.f32.mrf.mxu3  ;;  %v679_v56 = vsel %vm651_vm3, %v644_v53, 0.0 }
 0x13b   : > { %v569_v57 = vadd.f32 %v1394_v22, %v568_v55  ;;  %680 = vadd.xlane.f32.xlu0 %v679_v56  ;;  %v618_v58 = vsel %vm586_vm7, %v551_v51, %v602_v54 }
 0x13c   : > { %v638_v59 = vmul.f32 %v1400_v13, %v618_v58 }
 0x13d   : > { %vm593_vm8 = vcmp.gt.f32.partialorder %v569_v57, 0.0  ;;  %v609_v60 = vmul.f32 0.2, %v569_v57 }
 0x13e   : > { %v553_v61 = vpop.f32.mrf.mxu1  ;;  %v661_v62 = vsel %vm651_vm3, %v638_v59, 0.0 }
 0x13f   : > { %v554_v63 = vadd.f32 %v1394_v22, %v553_v61  ;;  %662 = vadd.xlane.f32.xlu1 %v661_v62  ;;  %v625_v0 = vsel %vm593_vm8, %v569_v57, %v609_v60  ;;  %v1449_v57 = vstv %s700_s23 }
 0x140   : > { %v645_v3 = vmul.f32 %v1400_v13, %v625_v0 }
 0x141   : > { %vm587_vm9 = vcmp.gt.f32.partialorder %v554_v63, 0.0  ;;  %v603_v1 = vmul.f32 0.2, %v554_v63 }
 0x142   : > { %v570_v2 = vpop.f32.mrf.mxu3  ;;  %v682_v10 = vsel %vm651_vm3, %v645_v3, 0.0 }
 0x143   : > { %v571_v4 = vadd.f32 %v1394_v22, %v570_v2  ;;  %v619_v5 = vsel %vm587_vm9, %v554_v63, %v603_v1 }
 0x144   : > { %v639_v6 = vmul.f32 %v1400_v13, %v619_v5 }
 0x145   : > { %vm594_vm10 = vcmp.gt.f32.partialorder %v571_v4, 0.0  ;;  %v610_v7 = vmul.f32 0.2, %v571_v4 }
 0x146   : > { %v555_v8 = vpop.f32.mrf.mxu1  ;;  %v664_v9 = vsel %vm651_vm3, %v639_v6, 0.0 }
 0x147   : > { %v556_v11 = vadd.f32 %v1394_v22, %v555_v8  ;;  %665 = vadd.xlane.f32.xlu2 %v664_v9  ;;  %683 = vadd.xlane.f32.xlu1 %v682_v10  ;;  %v626_v12 = vsel %vm594_vm10, %v571_v4, %v610_v7 }
 0x148   : > { %v646_v15 = vmul.f32 %v1400_v13, %v626_v12 }
 0x149   : > { %v604_v16 = vmul.f32 0.2, %v556_v11  ;;  %vm588_vm11 = vcmp.gt.f32.partialorder %v556_v11, 0.0 }
 0x14a   : > { %v573_v14 = vpop.f32.mrf.mxu3  ;;  %v685_v20 = vsel %vm651_vm3, %v646_v15, 0.0 }
 0x14b   : > { %v574_v17 = vadd.f32 %v1394_v22, %v573_v14  ;;  %v620_v24 = vsel %vm588_vm11, %v556_v11, %v604_v16 }
 0x14c   : > { %v640_v29 = vmul.f32 %v1400_v13, %v620_v24 }
 0x14d   : > { %vm595_vm12 = vcmp.gt.f32.partialorder %v574_v17, 0.0  ;;  %v611_v18 = vmul.f32 0.2, %v574_v17 }
 0x14e   : > { %v558_v19 = vpop.f32.mrf.mxu1  ;;  %v667_v32 = vsel %vm651_vm3, %v640_v29, 0.0 }
 0x14f   : > { %v559_v21 = vadd.f32 %v1394_v22, %v558_v19  ;;  %686 = vadd.xlane.f32.xlu2 %v685_v20  ;;  %v627_v23 = vsel %vm595_vm12, %v574_v17, %v611_v18 }
 0x150   : > { %v647_v25 = vmul.f32 %v1400_v13, %v627_v23 }
 0x151   : > { %vm589_vm13 = vcmp.gt.f32.partialorder %v559_v21, 0.0  ;;  %v605_v26 = vmul.f32 0.2, %v559_v21 }
 0x152   : > { %v575_v27 = vpop.f32.mrf.mxu3  ;;  %v688_v28 = vsel %vm651_vm3, %v647_v25, 0.0 }
 0x153   : > { %689 = vadd.xlane.f32.xlu0 %v688_v28  ;;  %v621_v30 = vsel %vm589_vm13, %v559_v21, %v605_v26  ;;  %v576_v34 = vadd.f32 %v1394_v22, %v575_v27 }
 0x154   : > { %v641_v33 = vmul.f32 %v1400_v13, %v621_v30 }
 0x155   : > { %v612_v39 = vmul.f32 0.2, %v576_v34  ;;  %vm596_vm15 = vcmp.gt.f32.partialorder %v576_v34, 0.0 }
 0x156   : > { %v560_v31 = vpop.f32.mrf.mxu1  ;;  %v670_v38 = vsel %vm651_vm3, %v641_v33, 0.0 }
 0x157   : > { %v561_v35 = vadd.f32 %v1394_v22, %v560_v31  ;;  %668 = vadd.xlane.f32.xlu2 %v667_v32  ;;  %v628_v46 = vsel %vm596_vm15, %v576_v34, %v612_v39 }
 0x158   : > { %v648_v50 = vmul.f32 %v1400_v13, %v628_v46 }
 0x159   : > { %vm590_vm14 = vcmp.gt.f32.partialorder %v561_v35, 0.0  ;;  %v606_v36 = vmul.f32 0.2, %v561_v35 }
 0x15a   : > { %v578_v37 = vpop.f32.mrf.mxu3  ;;  %v691_v53 = vsel %vm651_vm3, %v648_v50, 0.0 }
 0x15b   : > { %v579_v40 = vadd.f32 %v1394_v22, %v578_v37  ;;  %671 = vadd.xlane.f32.xlu0 %v670_v38  ;;  %v622_v41 = vsel %vm590_vm14, %v561_v35, %v606_v36 }
 0x15c   : > { %v642_v42 = vmul.f32 %v1400_v13, %v622_v41 }
 0x15d   : > { %vm597_vm1 = vcmp.gt.f32.partialorder %v579_v40, 0.0  ;;  %v613_v43 = vmul.f32 0.2, %v579_v40 }
 0x15e   : > { %v673_v44 = vsel %vm651_vm3, %v642_v42, 0.0 }
 0x15f   : > { %674 = vadd.xlane.f32.xlu1 %v673_v44  ;;  %v629_v45 = vsel %vm597_vm1, %v579_v40, %v613_v43 }
 0x160   : > { %v649_v47 = vmul.f32 %v1400_v13, %v629_v45 }
 0x162   : > { %v580_v48 = vpop.f32.mrf.mxu3  ;;  %v694_v49 = vsel %vm651_vm3, %v649_v47, 0.0 }
 0x163   : > { %v581_v51 = vadd.f32 %v1394_v22, %v580_v48  ;;  %695 = vadd.xlane.f32.xlu2 %v694_v49 }
 0x165   : > { %vm598_vm2 = vcmp.gt.f32.partialorder %v581_v51, 0.0  ;;  %v614_v52 = vmul.f32 0.2, %v581_v51 }
 0x167   : > { %692 = vadd.xlane.f32.xlu1 %v691_v53  ;;  %v630_v54 = vsel %vm598_vm2, %v581_v51, %v614_v52 }
 0x168   : > { %v650_v55 = vmul.f32 %v1400_v13, %v630_v54 }
 0x16a   : > { %v697_v56 = vsel %vm651_vm3, %v650_v55, 0.0 }
 0x16b   : > { %698 = vadd.xlane.f32.xlu0 %v697_v56 }
 0x19a   : > { %v654_v58 = vpop.xlane.xlu0 %653 }
 0x19b   : > { %v702_v59 = vadd.f32 %v1449_v57, %v654_v58 }
 0x19d   : > { %v1168_v60 = vmul.f32 -1.442695, %v702_v59 }
 0x19f   : > { %1213 = vpow2.f32 %v1168_v60 }
 0x1a2   : > { %v657_v22 = vpop.xlane.xlu0 %656 }
 0x1a3   : > { %v703_v61 = vadd.f32 %v1449_v57, %v657_v22 }
 0x1a5   : > { %v1214_v62 = vpop.eup %1213  ;;  %v1169_v63 = vmul.f32 -1.442695, %v703_v61 }
 0x1a6   : > { %v766_v0 = vadd.f32 1.0, %v1214_v62  ;;  %v678_v1 = vpop.xlane.xlu2 %677 }
 0x1a7   : > { %1215 = vpow2.f32 %v1169_v63  ;;  %v710_v13 = vadd.f32 %v1449_v57, %v678_v1 }
 0x1a8   : > { %1217 = vrcp.f32 %v766_v0  ;;  %v791_v16 = vand.u32 2147483647, %v766_v0  ;;  %v793_v17 = vand.u32 2147483648, %v766_v0  ;;  %vm787_vm0 = vweird.f32 %v766_v0 }
 0x1a9   : > { %v1176_v2 = vmul.f32 -1.442695, %v710_v13 }
 0x1aa   : > { %v660_v3 = vpop.xlane.xlu1 %659  ;;  %v794_v27 = vor.u32 1.1754944e-38, %v793_v17  ;;  %vm792_vm6 = vcmp.eq.f32.partialorder %v791_v16, 8.507059e+37 }
 0x1ab   : > { %1219 = vpow2.f32 %v1176_v2  ;;  %v704_v4 = vadd.f32 %v1449_v57, %v660_v3 }
 0x1ad   : > { %v1216_v5 = vpop.eup %1215  ;;  %v1170_v6 = vmul.f32 -1.442695, %v704_v4 }
 0x1ae   : > { %v1218_v7 = vpop.eup %1217  ;;  %v767_v8 = vadd.f32 1.0, %v1216_v5  ;;  %v681_v9 = vpop.xlane.xlu0 %680 }
 0x1af   : > { %v783_v10 = vmul.f32 %v1218_v7, %v766_v0  ;;  %1221 = vpow2.f32 %v1170_v6  ;;  %v711_v11 = vadd.f32 %v1449_v57, %v681_v9  ;;  %vm788_vm3 = vweird.f32 %v1218_v7 }
 0x1b0   : > { %1223 = vrcp.f32 %v767_v8  ;;  %vm789_vm5 = vmor %vm787_vm0, %vm788_vm3  ;;  %v806_v32 = vand.u32 2147483647, %v767_v8  ;;  %v808_v36 = vand.u32 2147483648, %v767_v8  ;;  %vm802_vm8 = vweird.f32 %v767_v8 }
 0x1b1   : > { %v1220_v12 = vpop.eup %1219  ;;  %v784_v14 = vsub.f32 1.0, %v783_v10  ;;  %v1177_v15 = vmul.f32 -1.442695, %v711_v11 }
 0x1b2   : > { %v1456_v18 = vadd.f32 1.0, %v1220_v12  ;;  %v663_v19 = vpop.xlane.xlu1 %662  ;;  %vm1474_vm9 = vcmp.eq.f32.partialorder %v806_v32, 8.507059e+37  ;;  %v809_v49 = vor.u32 1.1754944e-38, %v808_v36 }
 0x1b3   : > { %v785_v20 = vmul.f32 %v1218_v7, %v784_v14  ;;  %1225 = vpow2.f32 %v1177_v15  ;;  %v705_v21 = vadd.f32 %v1449_v57, %v663_v19 }
 0x1b4   : > { %1227 = vrcp.f32 %v1456_v18  ;;  %v911_v46 = vand.u32 2147483647, %v1456_v18  ;;  %v913_v50 = vand.u32 2147483648, %v1456_v18  ;;  %vm907_vm12 = vweird.f32 %v1456_v18 }
 0x1b5   : > { %v1222_v23 = vpop.eup %1221  ;;  %v786_v24 = vadd.f32 %v1218_v7, %v785_v20  ;;  %v1171_v25 = vmul.f32 -1.442695, %v705_v21 }
 0x1b6   : > { %v1224_v26 = vpop.eup %1223  ;;  %v1466_v28 = vadd.f32 1.0, %v1222_v23  ;;  %vm912_vm13 = vcmp.eq.f32.partialorder %v911_v46, 8.507059e+37  ;;  %v914_v61 = vor.u32 1.1754944e-38, %v913_v50 }
 0x1b7   : > { %v790_v29 = vsel %vm789_vm5, %v1218_v7, %v786_v24  ;;  %v798_v30 = vmul.f32 %v1224_v26, %v767_v8  ;;  %1229 = vpow2.f32 %v1171_v25  ;;  %vm803_vm7 = vweird.f32 %v1224_v26 }
 0x1b8   : > { %v795_v31 = vsel %vm792_vm6, %v794_v27, %v790_v29  ;;  %1231 = vrcp.f32 %v1466_v28  ;;  %vm804_vm10 = vmor %vm802_vm8, %vm803_vm7  ;;  %v821_v62 = vand.u32 2147483647, %v1466_v28  ;;  %v823_v63 = vand.u32 2147483648, %v1466_v28 }
 0x1b9   : > { %v1226_v33 = vpop.eup %1225  ;;  %1023 = vst.msk [vmem:[%s1464_s28] sm:$0xff] %vm1022_vm4, %v795_v31  ;;  %v799_v34 = vsub.f32 1.0, %v798_v30  ;;  %vm817_vm1 = vweird.f32 %v1466_v28 }
 0x1ba   : > { %v1228_v35 = vpop.eup %1227  ;;  %v1471_v37 = vadd.f32 1.0, %v1226_v33  ;;  %v666_v38 = vpop.xlane.xlu2 %665  ;;  %vm822_vm3 = vcmp.eq.f32.partialorder %v821_v62, 8.507059e+37  ;;  %v824_v10 = vor.u32 1.1754944e-38, %v823_v63 }
 0x1bb   : > { %v800_v39 = vmul.f32 %v1224_v26, %v799_v34  ;;  %v903_v40 = vmul.f32 %v1228_v35, %v1456_v18  ;;  %v684_v41 = vpop.xlane.xlu1 %683  ;;  %v706_v47 = vadd.f32 %v1449_v57, %v666_v38  ;;  %vm908_vm11 = vweird.f32 %v1228_v35 }
 0x1bc   : > { %1233 = vrcp.f32 %v1471_v37  ;;  %v712_v52 = vadd.f32 %v1449_v57, %v684_v41  ;;  %vm909_vm14 = vmor %vm907_vm12, %vm908_vm11  ;;  %v926_v8 = vand.u32 2147483647, %v1471_v37  ;;  %v928_v11 = vand.u32 2147483648, %v1471_v37 }
 0x1bd   : > { %v1230_v43 = vpop.eup %1229  ;;  %v801_v44 = vadd.f32 %v1224_v26, %v800_v39  ;;  %v904_v45 = vsub.f32 1.0, %v903_v40  ;;  %v1172_v60 = vmul.f32 -1.442695, %v706_v47  ;;  %vm922_vm5 = vweird.f32 %v1471_v37 }
 0x1be   : > { %v1232_v48 = vpop.eup %1231  ;;  %v1482_v51 = vadd.f32 1.0, %v1230_v43  ;;  %v1178_v0 = vmul.f32 -1.442695, %v712_v52  ;;  %vm927_vm6 = vcmp.eq.f32.partialorder %v926_v8, 8.507059e+37  ;;  %v929_v24 = vor.u32 1.1754944e-38, %v928_v11 }
 0x1bf   : > { %v805_v53 = vsel %vm804_vm10, %v1224_v26, %v801_v44  ;;  %v905_v54 = vmul.f32 %v1228_v35, %v904_v45  ;;  %v813_v55 = vmul.f32 %v1232_v48, %v1466_v28  ;;  %vm818_vm15 = vweird.f32 %v1232_v48 }
 0x1c0   : > { %v810_v56 = vsel %vm1474_vm9, %v809_v49, %v805_v53  ;;  %1235 = vrcp.f32 %v1482_v51  ;;  %vm819_vm2 = vmor %vm817_vm1, %vm818_vm15  ;;  %v836_v25 = vand.u32 2147483647, %v1482_v51  ;;  %v838_v26 = vand.u32 2147483648, %v1482_v51 }
 0x1c1   : > { %1024 = vst.msk [vmem:[%s1464_s28 + $0x8] sm:$0xff] %vm1022_vm4, %v810_v56  ;;  %v906_v58 = vadd.f32 %v1228_v35, %v905_v54  ;;  %v814_v59 = vsub.f32 1.0, %v813_v55  ;;  %1237 = vpow2.f32 %v1172_v60  ;;  %vm832_vm9 = vweird.f32 %v1482_v51 }
 0x1c2   : > { %v1234_v22 = vpop.eup %1233  ;;  %v687_v1 = vpop.xlane.xlu2 %686  ;;  %1239 = vpow2.f32 %v1178_v0  ;;  %v839_v38 = vor.u32 1.1754944e-38, %v838_v26  ;;  %vm837_vm11 = vcmp.eq.f32.partialorder %v836_v25, 8.507059e+37 }
 0x1c3   : > { %v910_v13 = vsel %vm909_vm14, %v1228_v35, %v906_v58  ;;  %v815_v2 = vmul.f32 %v1232_v48, %v814_v59  ;;  %v918_v3 = vmul.f32 %v1234_v22, %v1471_v37  ;;  %v713_v5 = vadd.f32 %v1449_v57, %v687_v1 }
 0x1c4   : > { %v915_v4 = vsel %vm912_vm13, %v914_v61, %v910_v13  ;;  %vm923_vm0 = vweird.f32 %v1234_v22 }
 0x1c5   : > { %1031 = vst.msk [vmem:[%s1464_s28 + $0x40] sm:$0xff] %vm1022_vm4, %v915_v4  ;;  %v816_v6 = vadd.f32 %v1232_v48, %v815_v2  ;;  %v919_v7 = vsub.f32 1.0, %v918_v3  ;;  %v1179_v12 = vmul.f32 -1.442695, %v713_v5  ;;  %vm924_vm7 = vmor %vm922_vm5, %vm923_vm0 }
 0x1c6   : > { %v1236_v9 = vpop.eup %1235  ;;  %v690_v14 = vpop.xlane.xlu0 %689 }
 0x1c7   : > { %v820_v15 = vsel %vm819_vm2, %v1232_v48, %v816_v6  ;;  %v920_v16 = vmul.f32 %v1234_v22, %v919_v7  ;;  %v828_v17 = vmul.f32 %v1236_v9, %v1482_v51  ;;  %1241 = vpow2.f32 %v1179_v12  ;;  %v1238_v23 = vpop.eup %1237 }
 0x1c8   : > { %v825_v18 = vsel %vm822_vm3, %v824_v10, %v820_v15  ;;  %v714_v19 = vadd.f32 %v1449_v57, %v690_v14  ;;  %v1240_v29 = vpop.eup %1239  ;;  %vm833_vm8 = vweird.f32 %v1236_v9  ;;  %v1508_v32 = vadd.f32 1.0, %v1238_v23 }
 0x1c9   : > { %1025 = vst.msk [vmem:[%s1464_s28 + $0x10] sm:$0xff] %vm1022_vm4, %v825_v18  ;;  %v921_v20 = vadd.f32 %v1234_v22, %v920_v16  ;;  %v829_v21 = vsub.f32 1.0, %v828_v17  ;;  %v1510_v34 = vadd.f32 1.0, %v1240_v29  ;;  %vm834_vm10 = vmor %vm832_vm9, %vm833_vm8 }
 0x1ca   : > { %v1180_v27 = vmul.f32 -1.442695, %v714_v19  ;;  %v669_v28 = vpop.xlane.xlu2 %668  ;;  %v851_v44 = vand.u32 2147483647, %v1508_v32  ;;  %v853_v46 = vand.u32 2147483648, %v1508_v32  ;;  %vm847_vm12 = vweird.f32 %v1508_v32 }
 0x1cb   : > { %v925_v30 = vsel %vm924_vm7, %v1234_v22, %v921_v20  ;;  %v830_v31 = vmul.f32 %v1236_v9, %v829_v21  ;;  %v707_v35 = vadd.f32 %v1449_v57, %v669_v28  ;;  %vm937_vm13 = vweird.f32 %v1510_v34 }
 0x1cc   : > { %v930_v33 = vsel %vm927_vm6, %v929_v24, %v925_v30  ;;  %1243 = vpow2.f32 %v1180_v27  ;;  %vm1532_vm14 = vcmp.eq.f32.partialorder %v851_v44, 8.507059e+37  ;;  %v941_v58 = vand.u32 2147483647, %v1510_v34 }
 0x1cd   : > { %1032 = vst.msk [vmem:[%s1464_s28 + $0x48] sm:$0xff] %vm1022_vm4, %v930_v33  ;;  %v831_v36 = vadd.f32 %v1236_v9, %v830_v31  ;;  %1245 = vrcp.f32 %v1508_v32  ;;  %v1242_v37 = vpop.eup %1241  ;;  %v1173_v43 = vmul.f32 -1.442695, %v707_v35  ;;  %v854_v60 = vor.u32 1.1754944e-38, %v853_v46 }
 0x1ce   : > { %1247 = vrcp.f32 %v1510_v34  ;;  %v1518_v40 = vadd.f32 1.0, %v1242_v37  ;;  %v672_v41 = vpop.xlane.xlu0 %671  ;;  %v943_v22 = vand.u32 2147483648, %v1510_v34  ;;  %vm1546_vm2 = vcmp.eq.f32.partialorder %v941_v58, 8.507059e+37 }
 0x1cf   : > { %v835_v39 = vsel %vm834_vm10, %v1236_v9, %v831_v36  ;;  %v708_v47 = vadd.f32 %v1449_v57, %v672_v41 }
 0x1d0   : > { %v840_v42 = vsel %vm837_vm11, %v839_v38, %v835_v39  ;;  %1249 = vrcp.f32 %v1518_v40  ;;  %v956_v0 = vand.u32 2147483647, %v1518_v40  ;;  %v958_v5 = vand.u32 2147483648, %v1518_v40 }
 0x1d1   : > { %1026 = vst.msk [vmem:[%s1464_s28 + $0x18] sm:$0xff] %vm1022_vm4, %v840_v42  ;;  %1251 = vpow2.f32 %v1173_v43  ;;  %v1174_v54 = vmul.f32 -1.442695, %v708_v47  ;;  %v944_v10 = vor.u32 1.1754944e-38, %v943_v22  ;;  %vm952_vm0 = vweird.f32 %v1518_v40 }
 0x1d2   : > { %v1244_v45 = vpop.eup %1243  ;;  %v675_v48 = vpop.xlane.xlu1 %674  ;;  %vm1560_vm7 = vcmp.eq.f32.partialorder %v956_v0, 8.507059e+37  ;;  %v959_v25 = vor.u32 1.1754944e-38, %v958_v5 }
 0x1d3   : > { %v1246_v49 = vpop.eup %1245  ;;  %v1526_v50 = vadd.f32 1.0, %v1244_v45  ;;  %v709_v51 = vadd.f32 %v1449_v57, %v675_v48 }
 0x1d4   : > { %v1248_v52 = vpop.eup %1247  ;;  %v843_v53 = vmul.f32 %v1246_v49, %v1508_v32  ;;  %vm848_vm15 = vweird.f32 %v1246_v49 }
 0x1d5   : > { %v933_v56 = vmul.f32 %v1248_v52, %v1510_v34  ;;  %1253 = vrcp.f32 %v1526_v50  ;;  %v1175_v1 = vmul.f32 -1.442695, %v709_v51  ;;  %vm938_vm1 = vweird.f32 %v1248_v52  ;;  %vm849_vm3 = vmor %vm847_vm12, %vm848_vm15 }
 0x1d6   : > { %v844_v59 = vsub.f32 1.0, %v843_v53  ;;  %1255 = vpow2.f32 %v1174_v54  ;;  %v696_v61 = vpop.xlane.xlu2 %695  ;;  %v1250_v62 = vpop.eup %1249  ;;  %vm939_vm5 = vmor %vm937_vm13, %vm938_vm1  ;;  %v971_v32 = vand.u32 2147483647, %v1526_v50  ;;  %v973_v33 = vand.u32 2147483648, %v1526_v50 }
 0x1d7   : > { %v934_v63 = vsub.f32 1.0, %v933_v56  ;;  %v716_v13 = vadd.f32 %v1449_v57, %v696_v61  ;;  %v1252_v2 = vpop.eup %1251  ;;  %v948_v4 = vmul.f32 %v1250_v62, %v1518_v40  ;;  %1257 = vpow2.f32 %v1175_v1 }
 0x1d8   : > { %v845_v3 = vmul.f32 %v1246_v49, %v844_v59  ;;  %v1544_v7 = vadd.f32 1.0, %v1252_v2  ;;  %vm953_vm6 = vweird.f32 %v1250_v62  ;;  %vm967_vm10 = vweird.f32 %v1526_v50 }
 0x1d9   : > { %v935_v6 = vmul.f32 %v1248_v52, %v934_v63  ;;  %v949_v11 = vsub.f32 1.0, %v948_v4  ;;  %v1182_v15 = vmul.f32 -1.442695, %v716_v13  ;;  %vm954_vm8 = vmor %vm952_vm0, %vm953_vm6  ;;  %v974_v44 = vor.u32 1.1754944e-38, %v973_v33 }
 0x1da   : > { %v846_v8 = vadd.f32 %v1246_v49, %v845_v3  ;;  %1259 = vrcp.f32 %v1544_v7  ;;  %v693_v20 = vpop.xlane.xlu1 %692  ;;  %vm972_vm12 = vcmp.eq.f32.partialorder %v971_v32, 8.507059e+37 }
 0x1db   : > { %v1254_v12 = vpop.eup %1253  ;;  %v936_v14 = vadd.f32 %v1248_v52, %v935_v6  ;;  %v950_v18 = vmul.f32 %v1250_v62, %v949_v11  ;;  %1261 = vpow2.f32 %v1182_v15  ;;  %v715_v34 = vadd.f32 %v1449_v57, %v693_v20 }
 0x1dc   : > { %v1256_v16 = vpop.eup %1255  ;;  %v850_v17 = vsel %vm849_vm3, %v1246_v49, %v846_v8  ;;  %v963_v19 = vmul.f32 %v1254_v12, %v1526_v50  ;;  %vm968_vm9 = vweird.f32 %v1254_v12 }
 0x1dd   : > { %v855_v21 = vsel %vm1532_vm14, %v854_v60, %v850_v17  ;;  %v940_v23 = vsel %vm939_vm5, %v1248_v52, %v936_v14  ;;  %v951_v27 = vadd.f32 %v1250_v62, %v950_v18  ;;  %v1568_v29 = vadd.f32 1.0, %v1256_v16  ;;  %v1258_v31 = vpop.eup %1257  ;;  %vm969_vm11 = vmor %vm967_vm10, %vm968_vm9 }
 0x1de   : > { %1027 = vst.msk [vmem:[%s1464_s28 + $0x20] sm:$0xff] %vm1022_vm4, %v855_v21  ;;  %v945_v26 = vsel %vm1546_vm2, %v944_v10, %v940_v23  ;;  %v964_v28 = vsub.f32 1.0, %v963_v19  ;;  %v699_v30 = vpop.xlane.xlu0 %698  ;;  %v1581_v39 = vadd.f32 1.0, %v1258_v31  ;;  %v1181_v43 = vmul.f32 -1.442695, %v715_v34 }
 0x1df   : > { %1033 = vst.msk [vmem:[%s1464_s28 + $0x50] sm:$0xff] %vm1022_vm4, %v945_v26  ;;  %v955_v35 = vsel %vm954_vm8, %v1250_v62, %v951_v27  ;;  %1263 = vrcp.f32 %v1568_v29  ;;  %v717_v40 = vadd.f32 %v1449_v57, %v699_v30  ;;  %v868_v57 = vand.u32 2147483648, %v1544_v7 }
 0x1e0   : > { %v965_v36 = vmul.f32 %v1254_v12, %v964_v28  ;;  %v1260_v37 = vpop.eup %1259  ;;  %v960_v38 = vsel %vm1560_vm7, %v959_v25, %v955_v35  ;;  %1265 = vrcp.f32 %v1581_v39  ;;  %v866_v52 = vand.u32 2147483647, %v1544_v7 }
 0x1e1   : > { %1034 = vst.msk [vmem:[%s1464_s28 + $0x58] sm:$0xff] %vm1022_vm4, %v960_v38  ;;  %v858_v42 = vmul.f32 %v1260_v37, %v1544_v7  ;;  %v1262_v47 = vpop.eup %1261  ;;  %1267 = vpow2.f32 %v1181_v43  ;;  %v1183_v49 = vmul.f32 -1.442695, %v717_v40  ;;  %vm863_vm13 = vweird.f32 %v1260_v37 }
 0x1e2   : > { %v966_v41 = vadd.f32 %v1254_v12, %v965_v36  ;;  %v780_v53 = vadd.f32 1.0, %v1262_v47  ;;  %vm862_vm14 = vweird.f32 %v1544_v7  ;;  %v869_v58 = vor.u32 1.1754944e-38, %v868_v57 }
 0x1e3   : > { %v859_v46 = vsub.f32 1.0, %v858_v42  ;;  %1269 = vpow2.f32 %v1183_v49  ;;  %vm864_vm15 = vmor %vm862_vm14, %vm863_vm13  ;;  %v883_v60 = vand.u32 2147483648, %v1568_v29  ;;  %vm867_vm1 = vcmp.eq.f32.partialorder %v866_v52, 8.507059e+37 }
 0x1e4   : > { %v970_v45 = vsel %vm969_vm11, %v1254_v12, %v966_v41  ;;  %1271 = vrcp.f32 %v780_v53  ;;  %v881_v1 = vand.u32 2147483647, %v1568_v29  ;;  %vm877_vm3 = vweird.f32 %v1568_v29 }
 0x1e5   : > { %v975_v48 = vsel %vm972_vm12, %v974_v44, %v970_v45  ;;  %v1264_v51 = vpop.eup %1263  ;;  %v860_v50 = vmul.f32 %v1260_v37, %v859_v46  ;;  %v884_v5 = vor.u32 1.1754944e-38, %v883_v60  ;;  %v898_v6 = vand.u32 2147483648, %v1581_v39 }
 0x1e6   : > { %1035 = vst.msk [vmem:[%s1464_s28 + $0x60] sm:$0xff] %vm1022_vm4, %v975_v48  ;;  %v873_v54 = vmul.f32 %v1264_v51, %v1568_v29  ;;  %v1266_v56 = vpop.eup %1265  ;;  %vm878_vm2 = vweird.f32 %v1264_v51  ;;  %v896_v9 = vand.u32 2147483647, %v1581_v39  ;;  %vm882_vm6 = vcmp.eq.f32.partialorder %v881_v1, 8.507059e+37 }
 0x1e7   : > { %v861_v55 = vadd.f32 %v1260_v37, %v860_v50  ;;  %v888_v61 = vmul.f32 %v1266_v56, %v1581_v39  ;;  %v1268_v62 = vpop.eup %1267  ;;  %vm879_vm0 = vmor %vm877_vm3, %vm878_vm2  ;;  %vm893_vm5 = vweird.f32 %v1266_v56  ;;  %vm892_vm7 = vweird.f32 %v1581_v39 }
 0x1e8   : > { %v874_v59 = vsub.f32 1.0, %v873_v54  ;;  %v779_v2 = vadd.f32 1.0, %v1268_v62  ;;  %vm894_vm8 = vmor %vm892_vm7, %vm893_vm5  ;;  %v899_v16 = vor.u32 1.1754944e-38, %v898_v6  ;;  %vm897_vm9 = vcmp.eq.f32.partialorder %v896_v9, 8.507059e+37 }
 0x1e9   : > { %v865_v22 = vsel %vm864_vm15, %v1260_v37, %v861_v55  ;;  %v889_v13 = vsub.f32 1.0, %v888_v61  ;;  %v1270_v3 = vpop.eup %1269  ;;  %v1003_v19 = vand.u32 2147483648, %v780_v53  ;;  %v1001_v23 = vand.u32 2147483647, %v780_v53 }
 0x1ea   : > { %v870_v63 = vsel %vm867_vm1, %v869_v58, %v865_v22  ;;  %v875_v0 = vmul.f32 %v1264_v51, %v874_v59  ;;  %v1272_v7 = vpop.eup %1271  ;;  %1273 = vrcp.f32 %v779_v2  ;;  %v781_v15 = vadd.f32 1.0, %v1270_v3 }
 0x1eb   : > { %1028 = vst.msk [vmem:[%s1464_s28 + $0x28] sm:$0xff] %vm1022_vm4, %v870_v63  ;;  %v890_v8 = vmul.f32 %v1266_v56, %v889_v13  ;;  %v993_v11 = vmul.f32 %v1272_v7, %v780_v53  ;;  %vm998_vm10 = vweird.f32 %v1272_v7  ;;  %vm997_vm11 = vweird.f32 %v780_v53 }
 0x1ec   : > { %v876_v4 = vadd.f32 %v1264_v51, %v875_v0  ;;  %1275 = vrcp.f32 %v781_v15  ;;  %vm999_vm12 = vmor %vm997_vm11, %vm998_vm10  ;;  %v1004_v27 = vor.u32 1.1754944e-38, %v1003_v19  ;;  %vm1002_vm13 = vcmp.eq.f32.partialorder %v1001_v23, 8.507059e+37 }
 0x1ed   : > { %v891_v14 = vadd.f32 %v1266_v56, %v890_v8  ;;  %v994_v17 = vsub.f32 1.0, %v993_v11  ;;  %v986_v32 = vand.u32 2147483647, %v779_v2  ;;  %v988_v33 = vand.u32 2147483648, %v779_v2 }
 0x1ee   : > { %v880_v10 = vsel %vm879_vm0, %v1264_v51, %v876_v4  ;;  %vm982_vm15 = vweird.f32 %v779_v2  ;;  %v1018_v39 = vand.u32 2147483648, %v781_v15  ;;  %v1016_v42 = vand.u32 2147483647, %v781_v15 }
 0x1ef   : > { %v885_v12 = vsel %vm882_vm6, %v884_v5, %v880_v10  ;;  %v895_v18 = vsel %vm894_vm8, %v1266_v56, %v891_v14  ;;  %v995_v21 = vmul.f32 %v1272_v7, %v994_v17  ;;  %vm987_vm2 = vcmp.eq.f32.partialorder %v986_v32, 8.507059e+37 }
 0x1f0   : > { %1029 = vst.msk [vmem:[%s1464_s28 + $0x30] sm:$0xff] %vm1022_vm4, %v885_v12  ;;  %v900_v20 = vsel %vm897_vm9, %v899_v16, %v895_v18  ;;  %v1274_v24 = vpop.eup %1273  ;;  %v989_v38 = vor.u32 1.1754944e-38, %v988_v33  ;;  %vm1012_vm0 = vweird.f32 %v781_v15  ;;  %v1019_v45 = vor.u32 1.1754944e-38, %v1018_v39 }
 0x1f1   : > { %1030 = vst.msk [vmem:[%s1464_s28 + $0x38] sm:$0xff] %vm1022_vm4, %v900_v20  ;;  %v996_v25 = vadd.f32 %v1272_v7, %v995_v21  ;;  %v978_v26 = vmul.f32 %v1274_v24, %v779_v2  ;;  %vm983_vm14 = vweird.f32 %v1274_v24  ;;  %vm1017_vm6 = vcmp.eq.f32.partialorder %v1016_v42, 8.507059e+37 }
 0x1f2   : > { %v1276_v30 = vpop.eup %1275  ;;  %vm984_vm1 = vmor %vm982_vm15, %vm983_vm14 }
 0x1f3   : > { %v1000_v28 = vsel %vm999_vm12, %v1272_v7, %v996_v25  ;;  %v979_v29 = vsub.f32 1.0, %v978_v26  ;;  %v1008_v35 = vmul.f32 %v1276_v30, %v781_v15  ;;  %vm1013_vm3 = vweird.f32 %v1276_v30 }
 0x1f4   : > { %v1005_v31 = vsel %vm1002_vm13, %v1004_v27, %v1000_v28  ;;  %vm1014_vm5 = vmor %vm1012_vm0, %vm1013_vm3 }
 0x1f5   : > { %1037 = vst.msk [vmem:[%s1464_s28 + $0x70] sm:$0xff] %vm1022_vm4, %v1005_v31  ;;  %v980_v34 = vmul.f32 %v1274_v24, %v979_v29  ;;  %v1009_v37 = vsub.f32 1.0, %v1008_v35 }
 0x1f7   : > { %v981_v36 = vadd.f32 %v1274_v24, %v980_v34  ;;  %v1010_v41 = vmul.f32 %v1276_v30, %v1009_v37 }
 0x1f9   : > { %v985_v40 = vsel %vm984_vm1, %v1274_v24, %v981_v36  ;;  %v1011_v44 = vadd.f32 %v1276_v30, %v1010_v41 }
 0x1fa   : > { %v990_v43 = vsel %vm987_vm2, %v989_v38, %v985_v40 }
 0x1fb   : > { %1036 = vst.msk [vmem:[%s1464_s28 + $0x68] sm:$0xff] %vm1022_vm4, %v990_v43  ;;  %v1015_v46 = vsel %vm1014_vm5, %v1276_v30, %v1011_v44 }
 0x1fc   : > { %v1020_v47 = vsel %vm1017_vm6, %v1019_v45, %v1015_v46 }
 0x1fd   : > { %1038 = vst.msk [vmem:[%s1464_s28 + $0x78] sm:$0xff] %vm1022_vm4, %v1020_v47 }
 0x1fe PF: > { %s18_s26 = sadd.s32 1, %s1283_s26  }
 0x1ff   : > { %p15_p4 = scmp.ge.s32.totalorder %s18_s26, 4  }
 0x201   :  { %17 = sbr.rel (!%p15_p4) target bundleno = 2 (0x2), region = 78 }

</bundles_post_ra>
